<compile_context>
chip_gen: v5e
topology: v5e:2x2
jax: 0.10.0
libtpu: 0.0.40
codegen_flags: <defaults>
</compile_context>

<pallas_src>
import math

import jax
import jax.numpy as jnp
from jax.experimental import pallas as pl
from jax.experimental.pallas import tpu as pltpu


def _round_up(v, m):
    return ((v + m - 1) // m) * m


# ---------------------------------------------------------------------------
# Kernels
# ---------------------------------------------------------------------------
def _linear_kernel_f32(x_ref, wt_ref, b_ref, o_ref):
    """f32 output: accumulate directly into o_ref (resident across K axis)."""
    k = pl.program_id(2)
    prod = jnp.dot(x_ref[...], wt_ref[...], preferred_element_type=jnp.float32)

    @pl.when(k == 0)
    def _():
        # Bias added once, fused with the first K-step product.
        o_ref[...] = b_ref[...] + prod

    @pl.when(k > 0)
    def _():
        o_ref[...] += prod


def _linear_kernel_acc(x_ref, wt_ref, b_ref, o_ref, acc_ref):
    """Narrow-output path (e.g. bf16): f32 VMEM accumulator, cast on finalize."""
    k = pl.program_id(2)

    @pl.when(k == 0)
    def _():
        acc_ref[...] = jnp.zeros_like(acc_ref)

    acc_ref[...] += jnp.dot(
        x_ref[...], wt_ref[...], preferred_element_type=jnp.float32
    )

    @pl.when(k == pl.num_programs(2) - 1)
    def _():
        o_ref[...] = (acc_ref[...] + b_ref[...]).astype(o_ref.dtype)


# ---------------------------------------------------------------------------
# Tiling heuristics
# ---------------------------------------------------------------------------
def _pick_nk_tiles(N, K, itemsize, budget_bytes=24 * 1024 * 1024):
    """Pick (tn, tk) from N, K only (so the weight can be padded once)."""
    Np0 = _round_up(N, 128)
    Kp0 = _round_up(K, 128)

    def pick(dim, cands):
        for c in cands:
            if dim >= c:
                return c
        return 128

    # Prefer 256/512-multiples: the v6e/v7x MXU is 2x256x256, 128-wide tiles
    # only half-fill the systolic array.
    tn = pick(Np0, (512, 256, 128))
    tk = pick(Kp0, (512, 256, 128))

    # VMEM budget, worst case tm=512, weight triple-buffered, output resident.
    def workset(tm, tn_, tk_):
        return (2 * tm * tk_ + 3 * tk_ * tn_ + 3 * tm * tn_) * itemsize

    while workset(512, tn, tk) > budget_bytes and tk > 128:
        tk //= 2
    while workset(512, tn, tk) > budget_bytes and tn > 128:
        tn //= 2
    return tn, tk


def _pick_tm(M, itemsize):
    sub = 8 if itemsize >= 4 else 16  # bf16 packs 16 rows / vreg sublane group
    if M <= 256:
        # Small-M / GEMV-like regime: weight streaming, minimal M tile.
        return _round_up(max(M, 1), sub)
    return 512 if M >= 512 else 256


# ---------------------------------------------------------------------------
# Forward
# ---------------------------------------------------------------------------
def make_linear(w, b, *, use_bf16_matmul=False):
    """One-time weight prep (transpose + pad) -> jitted y = x @ w.T + b."""
    N, K = w.shape
    param_dtype = jnp.bfloat16 if use_bf16_matmul else w.dtype
    itemsize = jnp.dtype(param_dtype).itemsize

    tn, tk = _pick_nk_tiles(N, K, itemsize)
    Np, Kp = _round_up(N, tn), _round_up(K, tk)

    # One-time HBM pass: transpose + pad the weight, pad the bias.
    wt_p = jnp.pad(jnp.asarray(w).T.astype(param_dtype),
                   ((0, Kp - K), (0, Np - N)))
    b_p = jnp.pad(jnp.asarray(b).astype(jnp.float32), (0, Np - N)).reshape(1, Np)

    def _fwd(x, wt, bias):
        lead = x.shape[:-1]
        M = math.prod(lead) if lead else 1
        x2 = x.reshape(M, K)
        out_dtype = x.dtype

        tm = _pick_tm(M, itemsize)
        Mp = _round_up(M, tm)

        x_mm = x2.astype(param_dtype)
        if Mp != M or Kp != K:
            x_mm = jnp.pad(x_mm, ((0, Mp - M), (0, Kp - K)))

        mg, ng, kg = Mp // tm, Np // tn, Kp // tk

        w_spec = pl.BlockSpec((tk, tn), lambda i, j, k: (k, j))
        if M <= 256 and kg >= 3:
            # Weight-streaming regime: deepen weight buffering to hide the DMA.
            w_spec = pl.BlockSpec((tk, tn), lambda i, j, k: (k, j),
                                  pipeline_mode=pl.Buffered(3))

        in_specs = [
            pl.BlockSpec((tm, tk), lambda i, j, k: (i, k)),   # x tile
            w_spec,                                           # W^T tile
            pl.BlockSpec((1, tn), lambda i, j, k: (0, j)),    # bias tile
        ]
        out_spec = pl.BlockSpec((tm, tn), lambda i, j, k: (i, j))

        if out_dtype == jnp.float32:
            kernel = _linear_kernel_f32
            scratch = []            # accumulate directly into the f32 output
        else:
            kernel = _linear_kernel_acc
            scratch = [pltpu.VMEM((tm, tn), jnp.float32)]

        out = pl.pallas_call(
            kernel,
            out_shape=jax.ShapeDtypeStruct((Mp, Np), out_dtype),
            grid_spec=pltpu.PrefetchScalarGridSpec(
                num_scalar_prefetch=0,
                grid=(mg, ng, kg),
                in_specs=in_specs,
                out_specs=out_spec,
                scratch_shapes=scratch,
            ),
            compiler_params=pltpu.CompilerParams(
                dimension_semantics=("parallel", "parallel", "arbitrary"),
                vmem_limit_bytes=32 * 1024 * 1024,   # raises v5e's 16 MiB default
            ),
        )(x_mm, wt, bias)

        if Mp != M or Np != N:
            out = out[:M, :N]
        return out.reshape(*lead, N)

    fwd_jit = jax.jit(_fwd)

    def fwd(x):
        return fwd_jit(x, wt_p, b_p)

    return fwd


def linear_pallas(x, w, b):
    """Convenience one-shot wrapper (prefer make_linear for repeated calls)."""
    return make_linear(w, b)(x)


if __name__ == "__main__":
    # Shapes implied by the forward: batch=8, input_dim=32, output_dim=16.
    B, D_in, D_out = 8, 32, 16

    key = jax.random.PRNGKey(0)
    kx, kw, kb = jax.random.split(key, 3)

    x = jax.random.normal(kx, (B, D_in), dtype=jnp.float32)
    # Deterministic parameter init (mimics nn.Linear uniform(-1/sqrt(D_in), 1/sqrt(D_in)))
    bound = 1.0 / (D_in ** 0.5)
    w = jax.random.uniform(kw, (D_out, D_in), minval=-bound, maxval=bound,
                           dtype=jnp.float32)
    b = jax.random.uniform(kb, (D_out,), minval=-bound, maxval=bound,
                           dtype=jnp.float32)

    linear = make_linear(w, b)      # one-time weight transpose/pad + jit
    out = linear(x)
    jax.block_until_ready(out)

    # Correctness check against the pure-JAX reference of nn.Linear
    ref = x @ w.T + b
    assert out.shape == (B, D_out)
    assert jnp.allclose(out, ref, atol=1e-5, rtol=1e-5)

    print("KERNEL_OK")
</pallas_src>

<mosaic_0001>
module attributes {stable_mosaic.version = 11 : i64} {
  func.func @_linear_kernel_f32(%arg0: i32, %arg1: i32, %arg2: i32, %arg3: memref<8x128xf32, #tpu.memory_space<vmem>>, %arg4: memref<128x128xf32, #tpu.memory_space<vmem>>, %arg5: memref<1x128xf32, #tpu.memory_space<vmem>>, %arg6: memref<8x128xf32, #tpu.memory_space<vmem>>) attributes {dimension_semantics = [#tpu.dimension_semantics<parallel>, #tpu.dimension_semantics<parallel>, #tpu.dimension_semantics<arbitrary>], iteration_bounds = array<i64: 1, 1, 1>, scalar_prefetch = 0 : i64, scratch_operands = 0 : i64, tpu.core_type = #tpu.core_type<tc>, window_params = [{transform_indices = @transform_0, window_bounds = array<i64: 8, 128>}, {transform_indices = @transform_1, window_bounds = array<i64: 128, 128>}, {transform_indices = @transform_2, window_bounds = array<i64: 1, 128>}, {transform_indices = @transform_3, window_bounds = array<i64: 8, 128>}]} {
    %c0 = arith.constant 0 : index
    %c0_0 = arith.constant 0 : index
    %0 = vector.load %arg3[%c0, %c0_0] : memref<8x128xf32, #tpu.memory_space<vmem>>, vector<8x128xf32>
    %c0_1 = arith.constant 0 : index
    %c0_2 = arith.constant 0 : index
    %1 = vector.load %arg4[%c0_1, %c0_2] : memref<128x128xf32, #tpu.memory_space<vmem>>, vector<128x128xf32>
    %cst = arith.constant dense<0.000000e+00> : vector<8x128xf32>
    %2 = tpu.matmul %0, %1, %cst {dimension_numbers = #tpu.dot_dimension_numbers<[1], [0], [0], [1], [0, 0, 1, 1], [], []>} : vector<8x128xf32>, vector<128x128xf32>, vector<8x128xf32> -> vector<8x128xf32>
    %c0_i32 = arith.constant 0 : i32
    %3 = arith.cmpi eq, %arg2, %c0_i32 : i32
    %4 = arith.extui %3 : i1 to i32
    %c0_i32_3 = arith.constant 0 : i32
    %5 = arith.cmpi ne, %4, %c0_i32_3 : i32
    scf.if %5 {
      %c0_6 = arith.constant 0 : index
      %c0_7 = arith.constant 0 : index
      %9 = vector.load %arg5[%c0_6, %c0_7] : memref<1x128xf32, #tpu.memory_space<vmem>>, vector<1x128xf32>
      %10 = vector.broadcast %9 : vector<1x128xf32> to vector<8x128xf32>
      %11 = arith.addf %10, %2 : vector<8x128xf32>
      %c0_8 = arith.constant 0 : index
      %c0_9 = arith.constant 0 : index
      %12 = vector.load %arg6[%c0_8, %c0_9] : memref<8x128xf32, #tpu.memory_space<vmem>>, vector<8x128xf32>
      tpu.vector_store %arg6[%c0_8, %c0_9], %11 {strides = array<i32>} : memref<8x128xf32, #tpu.memory_space<vmem>>, vector<8x128xf32>,
    } else {
    }
    %c0_i32_4 = arith.constant 0 : i32
    %6 = arith.cmpi sgt, %arg2, %c0_i32_4 : i32
    %7 = arith.extui %6 : i1 to i32
    %c0_i32_5 = arith.constant 0 : i32
    %8 = arith.cmpi ne, %7, %c0_i32_5 : i32
    scf.if %8 {
      %c0_6 = arith.constant 0 : index
      %c0_7 = arith.constant 0 : index
      %9 = vector.load %arg6[%c0_6, %c0_7] : memref<8x128xf32, #tpu.memory_space<vmem>>, vector<8x128xf32>
      %10 = arith.addf %9, %2 : vector<8x128xf32>
      %c0_8 = arith.constant 0 : index
      %c0_9 = arith.constant 0 : index
      %11 = vector.load %arg6[%c0_8, %c0_9] : memref<8x128xf32, #tpu.memory_space<vmem>>, vector<8x128xf32>
      tpu.vector_store %arg6[%c0_8, %c0_9], %10 {strides = array<i32>} : memref<8x128xf32, #tpu.memory_space<vmem>>, vector<8x128xf32>,
    } else {
    }
    return
  }
  func.func @transform_0(%arg0: i32, %arg1: i32, %arg2: i32) -> (i32, i32) {
    %c0_i32 = arith.constant 0 : i32
    return %arg0, %arg2 : i32, i32
  }
  func.func @transform_1(%arg0: i32, %arg1: i32, %arg2: i32) -> (i32, i32) {
    %c0_i32 = arith.constant 0 : i32
    return %arg2, %arg1 : i32, i32
  }
  func.func @transform_2(%arg0: i32, %arg1: i32, %arg2: i32) -> (i32, i32) {
    %c0_i32 = arith.constant 0 : i32
    %c0_i32_0 = arith.constant 0 : i32
    return %c0_i32, %arg1 : i32, i32
  }
  func.func @transform_3(%arg0: i32, %arg1: i32, %arg2: i32) -> (i32, i32) {
    %c0_i32 = arith.constant 0 : i32
    return %arg0, %arg1 : i32, i32
  }
}

</mosaic_0001>

<bundles_post_ra>
// kernel: _fwd.1
= control target key start
LH: loop header
LB: loop body
LE: loop exit
PB: predicated region body
PF: predicated region fallthrough
CT: control target
= control target key end

     0   :  { %8 = vsyncpa [#allocation3], 0  ;;  %s195_s0 = inlined_call_operand.vmem [shape: f32[8,128], index: 0, kind: input, shape index: {}]   ;;  %s196_s1 = inlined_call_operand.hbm [shape: f32[128,128], index: 1, kind: input, shape index: {}]   ;;  %s197_s2 = inlined_call_operand.vmem [shape: f32[1,128], index: 2, kind: input, shape index: {}]   ;;  %s198_s3 = inlined_call_operand.hbm [shape: f32[8,128], index: 3, kind: output, shape index: {}]  }
   0x1   :  { %9 = vsyncpa [#allocation4], 0  ;;  %s16_s14 = sshll.u32 %s196_s1, 4  ;;  %s159_s15 = smov [#allocation2]   ;;  %s17_s14 = int_to_ptr.hbm [resolvable:$true] %s16_s14 }
   0x2   :  { %s18_s16 = sshll.u32 %s159_s15, 4  ;;  %s160_s17 = smov 128   ;;  %s19_s16 = int_to_ptr.vmem [resolvable:$true] %s18_s16 }
   0x3   :  { %s161_s18 = smov 8  }
   0x4   :  { %24 = dma.hbm_to_vmem [thread:$0]  %s17_s14, 2048, %s19_s16, [#allocation3], %s160_s17, %s160_s17, %s161_s18  }
   0x5   :  { %155 = dma.done.wait [#allocation3], 2048  }
   0x6   :  { %156 = vsyncadd [#allocation3], 4294965248  ;;  %v47_v0 = vld [vmem:[#allocation2 + $0x78] sm:$0xff]  ;;  %v46_v1 = vld [vmem:[#allocation2 + $0x70] sm:$0xff]  ;;  %s162_s22 = smov [#allocation5]   ;;  %s92_s26 = sshll.u32 %s198_s3, 4  ;;  %s93_s26 = int_to_ptr.hbm [resolvable:$true] %s92_s26 }
   0x7   :  { %48 = vmatpush.msra.mxu0 %v47_v0  ;;  %v45_v2 = vld [vmem:[#allocation2 + $0x68] sm:$0xff]  ;;  %v44_v3 = vld [vmem:[#allocation2 + $0x60] sm:$0xff]  ;;  %v43_v4 = vld [vmem:[#allocation2 + $0x58] sm:$0xff]  ;;  %s90_s23 = sshll.u32 %s162_s22, 4  ;;  %s91_s23 = int_to_ptr.vmem [resolvable:$true] %s90_s23 }
   0x8   :  { %v42_v5 = vld [vmem:[#allocation2 + $0x50] sm:$0xff]  ;;  %v41_v6 = vld [vmem:[#allocation2 + $0x48] sm:$0xff]  ;;  %v40_v7 = vld [vmem:[#allocation2 + $0x40] sm:$0xff] }
   0x9   :  { %49 = vmatpush.msra.mxu0 %v46_v1  ;;  %v39_v8 = vld [vmem:[#allocation2 + $0x38] sm:$0xff]  ;;  %v38_v9 = vld [vmem:[#allocation2 + $0x30] sm:$0xff]  ;;  %v37_v10 = vld [vmem:[#allocation2 + $0x28] sm:$0xff] }
   0xa   :  { %v36_v11 = vld [vmem:[#allocation2 + $0x20] sm:$0xff]  ;;  %v35_v12 = vld [vmem:[#allocation2 + $0x18] sm:$0xff]  ;;  %v34_v13 = vld [vmem:[#allocation2 + $0x10] sm:$0xff] }
   0xb   :  { %50 = vmatpush.msra.mxu0 %v45_v2  ;;  %v33_v14 = vld [vmem:[#allocation2 + $0x8] sm:$0xff]  ;;  %v32_v15 = vld [vmem:[#allocation2] sm:$0xff] }
   0xc   :  { %v31_v16 = vld [vmem:[%s195_s0] sm:$0xff] }
   0xd   :  { %51 = vmatpush.msra.mxu0 %v44_v3  ;;  %v106_v17 = vld [vmem:[%s197_s2] ss:$0 sm:$0xff] }
   0xf   :  { %52 = vmatpush.msra.mxu0 %v43_v4 }
  0x11   :  { %53 = vmatpush.msra.mxu0 %v42_v5 }
  0x13   :  { %54 = vmatpush.msra.mxu0 %v41_v6 }
  0x15   :  { %55 = vmatpush.msra.mxu0 %v40_v7 }
  0x17   :  { %56 = vmatpush.msra.mxu0 %v39_v8 }
  0x19   :  { %57 = vmatpush.msra.mxu0 %v38_v9 }
  0x1b   :  { %58 = vmatpush.msra.mxu0 %v37_v10 }
  0x1d   :  { %59 = vmatpush.msra.mxu0 %v36_v11 }
  0x1f   :  { %60 = vmatpush.msra.mxu0 %v35_v12 }
  0x21   :  { %61 = vmatpush.msra.mxu0 %v34_v13 }
  0x23   :  { %62 = vmatpush.msra.mxu0 %v33_v14 }
  0x25   :  { %63 = vmatpush.msra.mxu0 %v32_v15 }
  0x26   :  { %64 = vmatmul.f32.vlgmr.msra.gmra.mxu0 %v31_v16 }
  0xa3   :  { %v65_v18 = vpop.f32.mrf.mxu0 }
  0xa4   :  { %v76_v19 = vadd.f32 %v106_v17, %v65_v18 }
  0xa6   :  { %77 = vst [vmem:[#allocation5] sm:$0xff] %v76_v19 }
  0xa7   :  { %95 = dma.vmem_to_hbm [thread:$0]  %s91_s23, 128, %s93_s26, [#allocation4]  }
  0xa8   :  { %157 = dma.done.wait [#allocation4], 128  }
  0xa9   :  { %158 = vsyncadd [#allocation4], 4294967168 }
  0xaa   :  { %100 = vsyncpa [#allocation3], 1 }
  0xab   :  { %101 = vsyncpa [#allocation4], 1 }

</bundles_post_ra>
